<compile_context>
chip_gen: v7x
topology: tpu7x:2x2x1
jax: 0.10.0
libtpu: 0.0.40
codegen_flags: <defaults>
</compile_context>

<pallas_src>
import itertools

import numpy as np
import jax
import jax.numpy as jnp
from jax.experimental import pallas as pl
from jax.experimental.pallas import tpu as pltpu

COST_CLASS = 1.0   # HungarianMatcher(cost_class=1.0, cost_point=0.05)
COST_POINT = 0.05
EOS_COEF = 0.1

LANE = 128
SUBLANE = 8
MAX_Q_TILE = 1024          # queries per cost-kernel block (multiple of 8)
MAX_GT_TILE = 512          # GT columns per cost-kernel block (multiple of 128)
MAX_N_TILE = 4096          # flattened B*Q lanes per loss-kernel block
VMEM_LIMIT = 32 * 1024 * 1024   # explicit scoped-VMEM budget (fits v5e..v7x)


def _round_up(x, m):
    return ((x + m - 1) // m) * m


def _pick_tile(total, max_tile, align):
    """Return (padded_total, tile) with padded_total % tile == 0, tile % align == 0."""
    if total <= max_tile:
        t = max(_round_up(total, align), align)
        return t, t
    return _round_up(total, max_tile), max_tile


# ------------------------- Pallas kernels -------------------------

def _cost_kernel(logits_ref, points_ref, gt_t_ref, labels_ref, cost_ref):
    # Per-block (batch dim squeezed): logits (QT, Cp), points (QT, 2),
    # gt_t (2, GT), labels (1, GT) int32  ->  cost (QT, GT), GT lane-dense.
    logits = logits_ref[...].astype(jnp.float32)              # (QT, Cp)
    m = jnp.max(logits, axis=-1, keepdims=True)
    e = jnp.exp(logits - m)
    s = jnp.sum(e, axis=-1, keepdims=True)
    prob = e * pl.reciprocal(s, approx=True)                  # softmax(-1), EUP recip

    labels = labels_ref[...]                                  # (1, GT) int32
    Cp = logits.shape[-1]
    if Cp == 2:
        # cost_class[q, g] = -prob[q, labels[g]] : one lane-dense select.
        cost_class = -jnp.where(labels == 0, prob[:, 0:1], prob[:, 1:2])
    else:
        sel = (labels == 0).astype(jnp.float32) * prob[:, 0:1]
        for c in range(1, Cp):
            sel = sel + (labels == c).astype(jnp.float32) * prob[:, c:c + 1]
        cost_class = -sel

    # cost_point = cdist(points, gt, p=2) via lane-dense broadcasts of the
    # pre-transposed GT coords (no 3-D lane-sparse intermediate).
    p = points_ref[...].astype(jnp.float32)                   # (QT, 2)
    gx = gt_t_ref[0:1, :].astype(jnp.float32)                 # (1, GT)
    gy = gt_t_ref[1:2, :].astype(jnp.float32)                 # (1, GT)
    dx = p[:, 0:1] - gx
    dy = p[:, 1:2] - gy
    cost_point = jnp.sqrt(dx * dx + dy * dy)                  # (QT, GT)

    cost_ref[...] = COST_POINT * cost_point + COST_CLASS * cost_class


def _loss_reduce_kernel(logits_ref, tgt_ref, w_ref, src_ref, dst_ref, out_ref):
    # Fused weighted cross-entropy + matched-point MSE reduction over lane-dense
    # (rows, N_tile) blocks, accumulated into an SMEM (3,) output:
    #   out[0] = sum_i w[y_i]*nll_i   out[1] = sum_i w[y_i]   out[2] = MSE sum
    @pl.when(pl.program_id(0) == 0)
    def _():
        out_ref[0] = 0.0
        out_ref[1] = 0.0
        out_ref[2] = 0.0

    logits = logits_ref[...].astype(jnp.float32)              # (Cp, NT)
    m = jnp.max(logits, axis=0, keepdims=True)
    z = logits - m
    s = jnp.sum(jnp.exp(z), axis=0, keepdims=True)
    logp = z - jnp.log(s)                                     # (Cp, NT)

    tgt = tgt_ref[...]                                        # (1, NT) int32, -1 = pad
    cls = jax.lax.broadcasted_iota(jnp.int32, logits.shape, 0)
    onehot = (cls == tgt).astype(jnp.float32)                 # (Cp, NT)
    w = w_ref[...].astype(jnp.float32)                        # (Cp, 1)

    nll = -jnp.sum(onehot * logp, axis=0, keepdims=True)      # (1, NT)
    wi = jnp.sum(onehot * w, axis=0, keepdims=True)           # (1, NT) class weight
    d = src_ref[...].astype(jnp.float32) - dst_ref[...].astype(jnp.float32)  # (2, NT)

    out_ref[0] += jnp.sum(wi * nll)
    out_ref[1] += jnp.sum(wi)
    out_ref[2] += jnp.sum(d * d)


# ------------------------- pallas_call wrappers -------------------------

def compute_matcher_cost(pred_logits, pred_points, gt_points_t, gt_labels_row,
                         q_tile, gt_tile):
    B, Qp, Cp = pred_logits.shape
    GP = gt_points_t.shape[-1]
    grid = (B, Qp // q_tile, GP // gt_tile)
    return pl.pallas_call(
        _cost_kernel,
        out_shape=jax.ShapeDtypeStruct((B, Qp, GP), jnp.float32),
        grid_spec=pltpu.PrefetchScalarGridSpec(
            num_scalar_prefetch=0,
            grid=grid,
            in_specs=[
                pl.BlockSpec((None, q_tile, Cp), lambda b, q, g: (b, q, 0)),
                pl.BlockSpec((None, q_tile, 2), lambda b, q, g: (b, q, 0)),
                pl.BlockSpec((None, 2, gt_tile), lambda b, q, g: (b, 0, g)),
                pl.BlockSpec((None, 1, gt_tile), lambda b, q, g: (b, 0, g)),
            ],
            out_specs=pl.BlockSpec((None, q_tile, gt_tile),
                                   lambda b, q, g: (b, q, g)),
        ),
        compiler_params=pltpu.CompilerParams(
            dimension_semantics=("parallel", "parallel", "parallel"),
            vmem_limit_bytes=VMEM_LIMIT),
    )(pred_logits, pred_points, gt_points_t, gt_labels_row)


def fused_loss_sums(logits_flat, tgt_flat, weight_col, src_flat, dst_flat, n_tile):
    Cp, Np = logits_flat.shape
    grid = (Np // n_tile,)
    return pl.pallas_call(
        _loss_reduce_kernel,
        out_shape=jax.ShapeDtypeStruct((3,), jnp.float32),
        grid_spec=pltpu.PrefetchScalarGridSpec(
            num_scalar_prefetch=0,
            grid=grid,
            in_specs=[
                pl.BlockSpec((Cp, n_tile), lambda i: (0, i)),
                pl.BlockSpec((1, n_tile), lambda i: (0, i)),
                pl.BlockSpec((Cp, 1), lambda i: (0, 0)),
                pl.BlockSpec((2, n_tile), lambda i: (0, i)),
                pl.BlockSpec((2, n_tile), lambda i: (0, i)),
            ],
            out_specs=pl.BlockSpec((3,), lambda i: (0,),
                                   memory_space=pltpu.MemorySpace.SMEM),
        ),
        compiler_params=pltpu.CompilerParams(
            dimension_semantics=("arbitrary",),
            vmem_limit_bytes=VMEM_LIMIT),
    )(logits_flat, tgt_flat, weight_col, src_flat, dst_flat)


# ------------------------- host-side matcher -------------------------

# TODO(synk): the Hungarian assignment is a combinatorial CPU step in the
# reference too (scipy inside torch.no_grad()); use scipy when available and
# fall back to exact brute force only for the tiny demo sizes.
def _linear_sum_assignment_bruteforce(cost):
    Q, G = cost.shape
    assert G <= Q
    best_sum, best_rows = None, None
    cols = list(range(G))
    for rows in itertools.permutations(range(Q), G):
        s = cost[list(rows), cols].sum()
        if best_sum is None or s < best_sum:
            best_sum, best_rows = s, rows
    row_ind = np.asarray(best_rows, dtype=np.int64)
    col_ind = np.arange(G, dtype=np.int64)
    order = np.argsort(row_ind)            # scipy returns rows sorted ascending
    return row_ind[order], col_ind[order]


def _linear_sum_assignment(cost):
    try:
        from scipy.optimize import linear_sum_assignment as _lsa
        row, col = _lsa(cost)
        return np.asarray(row), np.asarray(col)
    except Exception:
        return _linear_sum_assignment_bruteforce(cost)


# ------------------------- PointNetLoss.forward -------------------------

def point_net_loss(pred_logits, pred_points, gt_points, gt_labels, gt_counts,
                   num_classes=1, weight_dict=None, eos_coef=EOS_COEF):
    if weight_dict is None:
        weight_dict = {'loss_ce': 1.0, 'loss_points': 0.0002}
    B, Q, Cp = pred_logits.shape
    assert Cp == num_classes + 1

    # ---- host-side (numpy) GT padding / transpose -> lane-dense kernel rows ----
    gt_points_np = np.asarray(gt_points, np.float32)          # (B, Gmax, 2)
    gt_labels_np = np.asarray(gt_labels, np.int32)            # (B, Gmax)
    gt_counts_np = np.asarray(gt_counts, np.int64)
    Gmax = gt_points_np.shape[1]

    GP, gt_tile = _pick_tile(Gmax, MAX_GT_TILE, LANE)
    Qp, q_tile = _pick_tile(Q, MAX_Q_TILE, SUBLANE)

    gt_t_pad = np.zeros((B, 2, GP), np.float32)
    gt_t_pad[:, :, :Gmax] = gt_points_np.transpose(0, 2, 1)
    gt_lab_pad = np.zeros((B, 1, GP), np.int32)
    gt_lab_pad[:, 0, :Gmax] = gt_labels_np

    pred_logits = pred_logits.astype(jnp.float32)
    pred_points = pred_points.astype(jnp.float32)
    logits_cost, points_cost = pred_logits, pred_points
    if Qp != Q:
        logits_cost = jnp.pad(pred_logits, ((0, 0), (0, Qp - Q), (0, 0)))
        points_cost = jnp.pad(pred_points, ((0, 0), (0, Qp - Q), (0, 0)))

    gt_t_dev = jnp.asarray(gt_t_pad)
    gt_lab_dev = jnp.asarray(gt_lab_pad)

    # ---- matcher cost on device (Pallas, tiled over B x Q x GT) ----
    cost = compute_matcher_cost(logits_cost, points_cost, gt_t_dev, gt_lab_dev,
                                q_tile, gt_tile)

    # Single, sliced D2H transfer (padded GT/Q columns never leave the device).
    cost_np = np.asarray(jax.device_get(cost[:, :Q, :Gmax]), np.float32)

    indices = []
    for i in range(B):
        gi = int(gt_counts_np[i])
        row, col = _linear_sum_assignment(cost_np[i, :, :gi])
        indices.append((row, col))

    # ---- CE targets + matched-GT index per query (tiny int32 H2D only) ----
    target_classes = np.zeros((B, Q), np.int32)               # background = class 0
    match_idx = np.full((B, Q), -1, np.int32)                 # -1 = unmatched query
    for i, (row, col) in enumerate(indices):
        target_classes[i, row] = gt_labels_np[i, col]
        match_idx[i, row] = col.astype(np.int32)

    N = B * Q
    Np, n_tile = _pick_tile(N, MAX_N_TILE, LANE)

    tgt_flat_np = np.full((1, Np), -1, np.int32)              # -1 padding -> zero weight
    tgt_flat_np[0, :N] = target_classes.reshape(-1)

    empty_weight = np.ones((Cp, 1), np.float32)               # registered buffer
    empty_weight[0, 0] = eos_coef

    # ---- gather matched GT points on device (no point-tensor round trip) ----
    match_dev = jnp.asarray(match_idx)                                    # (B, Q)
    gather_idx = jnp.broadcast_to(jnp.clip(match_dev, 0)[:, None, :], (B, 2, Q))
    gathered = jnp.take_along_axis(gt_t_dev, gather_idx, axis=2)          # (B, 2, Q)
    pred_t = jnp.transpose(pred_points, (0, 2, 1))                        # (B, 2, Q)
    matched = (match_dev >= 0)[:, None, :]
    tgt_t = jnp.where(matched, gathered, pred_t)              # unmatched -> zero diff

    def _flat2(x_b2q):                                        # (B,2,Q) -> (2, Np)
        f = jnp.transpose(x_b2q, (1, 0, 2)).reshape(2, N)
        return jnp.pad(f, ((0, 0), (0, Np - N))) if Np != N else f

    logits_flat = jnp.transpose(pred_logits, (2, 0, 1)).reshape(Cp, N)
    if Np != N:
        logits_flat = jnp.pad(logits_flat, ((0, 0), (0, Np - N)))
    src_flat = _flat2(pred_t)
    dst_flat = _flat2(tgt_t)

    # ---- fused weighted cross-entropy + MSE reductions (single Pallas call) ----
    sums = fused_loss_sums(logits_flat, jnp.asarray(tgt_flat_np),
                           jnp.asarray(empty_weight), src_flat, dst_flat, n_tile)

    loss_ce = sums[0] / sums[1]                               # torch weighted-CE norm
    num_points = int(gt_counts_np.sum())
    loss_point = sums[2] / max(num_points, 1)

    losses = {'loss_ce': loss_ce, 'loss_point': loss_point}
    # Faithful to the reference: losses has key 'loss_point' but weight_dict has
    # 'loss_points', so the point loss is filtered out and total == 1.0 * loss_ce.
    weighted = {k: weight_dict[k] * v for k, v in losses.items() if k in weight_dict}
    total = sum(weighted.values())
    return total, losses


# ------------------------- demo -------------------------

if __name__ == "__main__":
    key = jax.random.PRNGKey(0)
    B, Q, num_classes = 2, 8, 1
    Cp = num_classes + 1
    Gmax = 4
    gt_counts = np.array([3, 4], np.int32)      # num_points = 7

    k1, k2, k3 = jax.random.split(key, 3)
    pred_logits = jax.random.normal(k1, (B, Q, Cp), dtype=jnp.float32)
    pred_points = jax.random.uniform(k2, (B, Q, 2), dtype=jnp.float32) * 128.0

    gt_points_np = np.asarray(jax.random.uniform(k3, (B, Gmax, 2), dtype=jnp.float32)) * 128.0
    gt_labels_np = np.ones((B, Gmax), np.int32)  # crowd-counting style: class 1 = "point"
    for i in range(B):                           # zero out padding slots
        gt_points_np[i, gt_counts[i]:] = 0.0
        gt_labels_np[i, gt_counts[i]:] = 0

    total, losses = point_net_loss(
        pred_logits, pred_points, gt_points_np, gt_labels_np, gt_counts,
        num_classes=num_classes)
    total = jax.block_until_ready(total)
    jax.block_until_ready(losses['loss_point'])
    assert np.isfinite(float(total)) and np.isfinite(float(losses['loss_point']))
    print("KERNEL_OK")
</pallas_src>

<mosaic_0001>
module attributes {stable_mosaic.version = 11 : i64} {
  func.func @_cost_kernel(%arg0: i32, %arg1: i32, %arg2: i32, %arg3: memref<1x8x2xf32, #tpu.memory_space<vmem>>, %arg4: memref<1x8x2xf32, #tpu.memory_space<vmem>>, %arg5: memref<1x2x128xf32, #tpu.memory_space<vmem>>, %arg6: memref<1x1x128xi32, #tpu.memory_space<vmem>>, %arg7: memref<1x8x128xf32, #tpu.memory_space<vmem>>) attributes {dimension_semantics = [#tpu.dimension_semantics<parallel>, #tpu.dimension_semantics<parallel>, #tpu.dimension_semantics<parallel>], iteration_bounds = array<i64: 2, 1, 1>, scalar_prefetch = 0 : i64, scratch_operands = 0 : i64, tpu.core_type = #tpu.core_type<tc>, window_params = [{transform_indices = @transform_0, window_bounds = array<i64: 1, 8, 2>}, {transform_indices = @transform_1, window_bounds = array<i64: 1, 8, 2>}, {transform_indices = @transform_2, window_bounds = array<i64: 1, 2, 128>}, {transform_indices = @transform_3, window_bounds = array<i64: 1, 1, 128>}, {transform_indices = @transform_4, window_bounds = array<i64: 1, 8, 128>}]} {
    %c0 = arith.constant 0 : index
    %c0_0 = arith.constant 0 : index
    %c0_1 = arith.constant 0 : index
    %0 = vector.load %arg3[%c0, %c0_0, %c0_1] : memref<1x8x2xf32, #tpu.memory_space<vmem>>, vector<1x8x2xf32>
    %1 = vector.shape_cast %0 : vector<1x8x2xf32> to vector<8x2xf32>
    %cst = arith.constant dense<0xFF800000> : vector<8xf32>
    %2 = vector.multi_reduction <maximumf>, %1, %cst [1] : vector<8x2xf32> to vector<8xf32>
    %3 = vector.shape_cast %2 : vector<8xf32> to vector<8x1xf32>
    %4 = vector.broadcast %3 : vector<8x1xf32> to vector<8x2xf32>
    %5 = arith.subf %1, %4 : vector<8x2xf32>
    %6 = math.exp %5 : vector<8x2xf32>
    %cst_2 = arith.constant dense<0.000000e+00> : vector<8xf32>
    %7 = vector.multi_reduction <add>, %6, %cst_2 [1] : vector<8x2xf32> to vector<8xf32>
    %8 = vector.shape_cast %7 : vector<8xf32> to vector<8x1xf32>
    %9 = tpu.reciprocal %8 {approx = true} : vector<8x1xf32> -> vector<8x1xf32>
    %10 = vector.broadcast %9 : vector<8x1xf32> to vector<8x2xf32>
    %11 = arith.mulf %6, %10 : vector<8x2xf32>
    %c0_3 = arith.constant 0 : index
    %c0_4 = arith.constant 0 : index
    %c0_5 = arith.constant 0 : index
    %12 = vector.load %arg6[%c0_3, %c0_4, %c0_5] : memref<1x1x128xi32, #tpu.memory_space<vmem>>, vector<1x1x128xi32>
    %13 = vector.shape_cast %12 : vector<1x1x128xi32> to vector<1x128xi32>
    %c0_i32 = arith.constant 0 : i32
    %14 = vector.broadcast %c0_i32 : i32 to vector<1x128xi32>
    %15 = arith.cmpi eq, %13, %14 : vector<1x128xi32>
    %16 = vector.extract_strided_slice %11 {offsets = [0, 0], sizes = [8, 1], strides = [1, 1]} : vector<8x2xf32> to vector<8x1xf32>
    %17 = vector.extract_strided_slice %11 {offsets = [0, 1], sizes = [8, 1], strides = [1, 1]} : vector<8x2xf32> to vector<8x1xf32>
    %18 = vector.shape_cast %15 : vector<1x128xi1> to vector<1x128xi1>
    %19 = vector.broadcast %18 : vector<1x128xi1> to vector<8x128xi1>
    %20 = vector.shape_cast %16 : vector<8x1xf32> to vector<8x1xf32>
    %21 = vector.broadcast %20 : vector<8x1xf32> to vector<8x128xf32>
    %22 = vector.shape_cast %17 : vector<8x1xf32> to vector<8x1xf32>
    %23 = vector.broadcast %22 : vector<8x1xf32> to vector<8x128xf32>
    %24 = arith.select %19, %21, %23 : vector<8x128xi1>, vector<8x128xf32>
    %cst_6 = arith.constant 0.000000e+00 : f32
    %25 = vector.broadcast %cst_6 : f32 to vector<8x128xf32>
    %26 = arith.subf %25, %24 : vector<8x128xf32>
    %c0_7 = arith.constant 0 : index
    %c0_8 = arith.constant 0 : index
    %c0_9 = arith.constant 0 : index
    %27 = vector.load %arg4[%c0_7, %c0_8, %c0_9] : memref<1x8x2xf32, #tpu.memory_space<vmem>>, vector<1x8x2xf32>
    %28 = vector.shape_cast %27 : vector<1x8x2xf32> to vector<8x2xf32>
    %c0_10 = arith.constant 0 : index
    %c0_11 = arith.constant 0 : index
    %c0_12 = arith.constant 0 : index
    %29 = vector.load %arg5[%c0_10, %c0_11, %c0_12] : memref<1x2x128xf32, #tpu.memory_space<vmem>>, vector<1x1x128xf32>
    %30 = vector.shape_cast %29 : vector<1x1x128xf32> to vector<1x128xf32>
    %c0_13 = arith.constant 0 : index
    %c1 = arith.constant 1 : index
    %c0_14 = arith.constant 0 : index
    %31 = vector.load %arg5[%c0_13, %c1, %c0_14] : memref<1x2x128xf32, #tpu.memory_space<vmem>>, vector<1x1x128xf32>
    %32 = vector.shape_cast %31 : vector<1x1x128xf32> to vector<1x128xf32>
    %33 = vector.extract_strided_slice %28 {offsets = [0, 0], sizes = [8, 1], strides = [1, 1]} : vector<8x2xf32> to vector<8x1xf32>
    %34 = vector.broadcast %33 : vector<8x1xf32> to vector<8x128xf32>
    %35 = vector.broadcast %30 : vector<1x128xf32> to vector<8x128xf32>
    %36 = arith.subf %34, %35 : vector<8x128xf32>
    %37 = vector.extract_strided_slice %28 {offsets = [0, 1], sizes = [8, 1], strides = [1, 1]} : vector<8x2xf32> to vector<8x1xf32>
    %38 = vector.broadcast %37 : vector<8x1xf32> to vector<8x128xf32>
    %39 = vector.broadcast %32 : vector<1x128xf32> to vector<8x128xf32>
    %40 = arith.subf %38, %39 : vector<8x128xf32>
    %41 = arith.mulf %36, %36 : vector<8x128xf32>
    %42 = arith.mulf %40, %40 : vector<8x128xf32>
    %43 = arith.addf %41, %42 : vector<8x128xf32>
    %44 = math.sqrt %43 : vector<8x128xf32>
    %cst_15 = arith.constant 5.000000e-02 : f32
    %45 = vector.broadcast %cst_15 : f32 to vector<8x128xf32>
    %46 = arith.mulf %45, %44 : vector<8x128xf32>
    %cst_16 = arith.constant 1.000000e+00 : f32
    %47 = vector.broadcast %cst_16 : f32 to vector<8x128xf32>
    %48 = arith.mulf %47, %26 : vector<8x128xf32>
    %49 = arith.addf %46, %48 : vector<8x128xf32>
    %c0_17 = arith.constant 0 : index
    %c0_18 = arith.constant 0 : index
    %c0_19 = arith.constant 0 : index
    %50 = vector.load %arg7[%c0_17, %c0_18, %c0_19] : memref<1x8x128xf32, #tpu.memory_space<vmem>>, vector<1x8x128xf32>
    %51 = vector.shape_cast %50 : vector<1x8x128xf32> to vector<8x128xf32>
    %52 = vector.shape_cast %49 : vector<8x128xf32> to vector<1x8x128xf32>
    tpu.vector_store %arg7[%c0_17, %c0_18, %c0_19], %52 {strides = array<i32>} : memref<1x8x128xf32, #tpu.memory_space<vmem>>, vector<1x8x128xf32>,
    return
  }
  func.func @transform_0(%arg0: i32, %arg1: i32, %arg2: i32) -> (i32, i32, i32) {
    %c0_i32 = arith.constant 0 : i32
    %c0_i32_0 = arith.constant 0 : i32
    return %arg0, %arg1, %c0_i32 : i32, i32, i32
  }
  func.func @transform_1(%arg0: i32, %arg1: i32, %arg2: i32) -> (i32, i32, i32) {
    %c0_i32 = arith.constant 0 : i32
    %c0_i32_0 = arith.constant 0 : i32
    return %arg0, %arg1, %c0_i32 : i32, i32, i32
  }
  func.func @transform_2(%arg0: i32, %arg1: i32, %arg2: i32) -> (i32, i32, i32) {
    %c0_i32 = arith.constant 0 : i32
    %c0_i32_0 = arith.constant 0 : i32
    return %arg0, %c0_i32, %arg2 : i32, i32, i32
  }
  func.func @transform_3(%arg0: i32, %arg1: i32, %arg2: i32) -> (i32, i32, i32) {
    %c0_i32 = arith.constant 0 : i32
    %c0_i32_0 = arith.constant 0 : i32
    return %arg0, %c0_i32, %arg2 : i32, i32, i32
  }
  func.func @transform_4(%arg0: i32, %arg1: i32, %arg2: i32) -> (i32, i32, i32) {
    %c0_i32 = arith.constant 0 : i32
    return %arg0, %arg1, %arg2 : i32, i32, i32
  }
}

</mosaic_0001>

<bundles_post_ra>
// kernel: tpu_custom_call.1
= control target key start
LH: loop header
LB: loop body
LE: loop exit
PB: predicated region body
PF: predicated region fallthrough
CT: control target
= control target key end

     0   :  { %9 = vsyncpa [#allocation3], 0  ;;  %s826_s0 = inlined_call_operand.vmem [shape: f32[2,8,2], index: 0, kind: input, shape index: {}]   ;;  %s827_s1 = inlined_call_operand.vmem [shape: f32[2,8,2], index: 1, kind: input, shape index: {}]   ;;  %s828_s2 = inlined_call_operand.vmem [shape: f32[2,2,128], index: 2, kind: input, shape index: {}]   ;;  %s829_s3 = inlined_call_operand.vmem [shape: s32[2,1,128], index: 3, kind: input, shape index: {}]   ;;  %s830_s4 = inlined_call_operand.hbm [shape: f32[2,8,128], index: 4, kind: output, shape index: {}]  }
   0x1   :  { %11 = vsyncpa [#allocation3 + $0x1], 0  ;;  %s698_s15 = smov 0   ;;  %s700_s16 = smov 0  }
   0x2   :  { %s702_s17 = smov 0   ;;  %s704_s18 = smov 0  }
   0x3   :  { %s706_s19 = smov 0   ;;  %s708_s20 = smov 0  }
   0x4 LB: > { %s508_s21 = sadd.s32 4294967295, %s668_s20   ;;  %s509_s22 = sadd.s32 4294967294, %s668_s20   ;;  %s668_s20 = sphi %s708_s20, %s17_s20   ;;  %s664_s19 = sphi %s706_s19, %s837_s19   ;;  %s660_s18 = sphi %s704_s18, %s836_s18   ;;  %s656_s17 = sphi %s702_s17, %s835_s17   ;;  %s652_s16 = sphi %s700_s16, %s834_s16   ;;  %s648_s15 = sphi %s698_s15, %s833_s15  }
   0x5   : > { %s36_s23 = sadd.s32 1, %s664_s19  ;;  %s159_s24 = sadd.s32 1, %s656_s17 }
   0x6   : > { %p38_p0 = scmp.ge.s32.totalorder %s36_s23, 2  ;;  %p169_p1 = scmp.ne.s32.totalorder %s656_s17, %s652_s16 }
   0x7   : > { %p170_p2 = scmp.eq.s32.totalorder %s508_s21, 1  ;;  %p175_p3 = scmp.ne.s32.totalorder %s652_s16, %s648_s15 }
   0x8   : > { %s839_s23 = smov (%p38_p0, %s36_s23), 0  ;;  %p176_p5 = scmp.eq.s32.totalorder %s509_s22, 1 }
   0x9   : > { %p738_p4 = por %p170_p2, %p169_p1  ;;  %s152_s26 = ssub.s32 %s664_s19, %s839_s23 }
   0xa   : > { %p512_p6 = scmp.ge.s32.totalorder %s668_s20, 1  ;;  %p157_p7 = scmp.eq.s32.totalorder %s152_s26, 0 }
   0xb   : > { %p745_p8 = por %p176_p5, %p175_p3  ;;  %p233_p9 = scmp.lt.s32.totalorder %s668_s20, 3 }
   0xc   : > { %s751_s28 = scalar_select %p157_p7, %s656_s17, %s159_s24  }
   0xd   : > { %p234_p10 = pnand %p512_p6, %p233_p9 }
   0xe   : > { %p281_p11 = scmp.lt.s32.totalorder (!%p234_p10), %s660_s18, 1  ;;  %vm309_vm0 = vcmask (!%p234_p10), 15360   ;;  %v670_v2 = vmov (!%p234_p10), 0   ;;  %v671_v4 = vmov (!%p234_p10), 1   ;;  %v324_v22 = vlaneseq (!%p234_p10)  ;;  %s278_s26 = sand.u32 (!%p234_p10), 1, %s652_s16  }
   0xf   : > { %237 = sbr.rel (%p234_p10) target bundleno = 488 (0x1e8), region = 36  ;;  %580 = vset.pattern.permute.xlu1 (!%p234_p10), %v670_v2  ;;  %582 = vset.pattern.permute.xlu0 (!%p234_p10), %v670_v2 }
  0x10   : > { %v325_v24 = vshrl.u32 (!%p234_p10), %v324_v22, 7 }
  0x12   : > { %v326_v26 = vsub.s32 (!%p234_p10), 0, %v325_v24 }
  0x16   : > { %s755_s29 = scalar_select %p281_p11, %s660_s18, 1 }
  0x18   : > { %s514_s30 = sshll.u32 %s755_s29, 3  ;;  %s516_s11 = sshll.u32 %s755_s29, 1 }
  0x19   : > { %s287_s7 = scalar_lea.vmem %s826_s0, %s514_s30  ;;  %s294_s10 = scalar_lea.vmem %s827_s1, %s514_s30 }
  0x1a   : > { %v308_v0 = vld [vmem:[%s287_s7] sm:$0xff]  ;;  %s301_s14 = scalar_lea.vmem %s828_s2, %s516_s11  ;;  %s307_s24 = scalar_lea.vmem %s829_s3, %s755_s29 }
  0x1b   : > { %v310_v1 = vsel %vm309_vm0, %v308_v0, -inf  ;;  %v340_v3 = vld [vmem:[%s294_s10] sm:$0xff]  ;;  %s513_s30 = sshll.u32 %s278_s26, 3  ;;  %s520_s29 = sshll.u32 %s660_s18, 7 }
  0x1c   : > { %311 = vmax.xlane.f32.xlu0 %v310_v1  ;;  %345 = vperm.xlu1 %580, %v340_v3   ;;  %v517_v14 = vld [vmem:[%s301_s14] ss:$0 sm:$0xff]  ;;  %v518_v15 = vld [vmem:[%s301_s14 + $0x1] ss:$0 sm:$0xff]  ;;  %s280_s5 = scalar_lea.vmem [#allocation2], %s513_s30  ;;  %s779_s9 = scalar_lea.hbm %s830_s4, %s520_s29 }
  0x1d   : > { %v321_v23 = vld [vmem:[%s307_s24] sm:$0x1]  ;;  %s391_s6 = sshll.u32 %s280_s5, 4  ;;  %s376_s10 = scalar_lea.sflag [#allocation3], %s278_s26  ;;  %s781_s6 = int_to_ptr.vmem [resolvable:$true] %s391_s6 }
  0x1e   : > { %vm322_vm1 = vcmp.eq.s32.totalorder %v321_v23, 0  ;;  %s590_s11 = scalar_lea.vmem %s781_s6, 128  ;;  %s672_s18 = smov [#allocation2]  }
  0x1f   : > { %v323_v27 = vsel %vm322_vm1, 1, %v670_v2  ;;  %p591_p12 = scmp.ne.s32.totalorder %s781_s6, %s590_s11  ;;  %s594_s12 = sshll.u32 %s672_s18, 4  ;;  %s595_s12 = int_to_ptr.vmem [resolvable:$false] %s594_s12 }
  0x20   : > { %581 = vset.pattern.permute.xlu1 %v671_v4  ;;  %v327_v29 = vrot.slane %v323_v27, %v326_v26  ;;  %s596_s13 = scalar_lea.vmem %s595_s12, 256  ;;  %p597_p1 = scmp.lt.s32.totalorder %s781_s6, %s595_s12 }
  0x21   : > { %354 = vperm.xlu1 %581, %v340_v3   ;;  %p592_p13 = pnand %p591_p12, %p738_p4  ;;  %p598_p2 = scmp.lt.s32.totalorder %s596_s13, %s590_s11 }
  0x22   : > { %vm328_vm4 = vcmp.eq.s32.totalorder %v327_v29, 1 }
  0x23   : > { %p593_p0 = pneg %p592_p13  ;;  %p599_p3 = por %p598_p2, %p597_p1 }
  0x25   : > { %p600_p5 = pnand %p599_p3, %p593_p0 }
  0x9b   : > { %v346_v13 = vpop.permute.xlu1 %345 }
  0x9c   : > { %v352_v17 = vsub.f32 %v346_v13, %v517_v14 }
  0x9e   : > { %v362_v19 = vmul.f32 %v352_v17, %v352_v17 }
  0xa0   : > { %v355_v16 = vpop.permute.xlu1 %354 }
  0xa1   : > { %v361_v18 = vsub.f32 %v355_v16, %v518_v15 }
  0xa3   : > { %v363_v20 = vmul.f32 %v361_v18, %v361_v18 }
  0xa5   : > { %v364_v21 = vadd.f32 %v363_v20, %v362_v19 }
  0xa7   : > { %vm367_vm2 = vcmp.eq.f32.partialorder %v364_v21, inf  ;;  %v370_v30 = vand.u32 2147483648, %v364_v21  ;;  %vm369_vm3 = vcmp.eq.f32.partialorder %v364_v21, 0.0 }
  0xa9   : > { %v312_v5 = vpop.xlane.xlu0 %311 }
  0xaa   : > { %v313_v6 = vsub.f32 %v308_v0, %v312_v5 }
  0xac   : > { %v314_v7 = vmul.f32 1.442695, %v313_v6 }
  0xae   : > { %584 = vpow2.f32 %v314_v7 }
  0xb8   : > { %v585_v8 = vpop.eup %584 }
  0xb9   : > { %v316_v9 = vsel %vm309_vm0, %v585_v8, 0.0 }
  0xba   : > { %317 = vadd.xlane.f32.xlu0 %v316_v9 }
 0x147   : > { %v318_v10 = vpop.xlane.xlu0 %317 }
 0x148   : > { %586 = vrcp.f32 %v318_v10 }
 0x149   : > { %588 = vrsqrt.f32 %v364_v21 }
 0x152   : > { %v587_v11 = vpop.eup %586 }
 0x153   : > { %v320_v12 = vmul.f32 %v587_v11, %v585_v8  ;;  %v589_v25 = vpop.eup %588 }
 0x154   : > { %v366_v28 = vmul.f32 %v589_v25, %v364_v21 }
 0x155   : > { %335 = vperm.xlu1 %581, %v320_v12   ;;  %331 = vperm.xlu0 %582, %v320_v12  }
 0x156   : > { %v368_v31 = vsel %vm367_vm2, %v364_v21, %v366_v28 }
 0x157   : > { %v371_v32 = vsel %vm369_vm3, %v370_v30, %v368_v31 }
 0x158   : > { %v372_v36 = vmul.f32 0.05, %v371_v32 }
 0x159   : > { %583 = vset.pattern.permute.xlu0 %v671_v4 }
 0x1d4   : > { %v336_v33 = vpop.permute.xlu1 %335  ;;  %v332_v34 = vpop.permute.xlu0 %331 }
 0x1d5   : > { %v338_v35 = vsel %vm328_vm4, %v332_v34, %v336_v33 }
 0x1d6   : > { %v339_v37 = vsub.f32 0.0, %v338_v35 }
 0x1d8   : > { %v373_v38 = vadd.f32 %v372_v36, %v339_v37 }
 0x1da   : > { %374 = vst [vmem:[%s280_s5] sm:$0xff] %v373_v38 }
 0x1db   : > { %603 = shalt.err (!%p600_p5)
}
 0x1dc   : > { %s604_s14 = scalar_lea.hbm %s779_s9, 128  ;;  %s608_s24 = scalar_lea.hbm %s830_s4, 256 }
 0x1dd   : > { %p605_p6 = scmp.ne.s32.totalorder %s779_s9, %s604_s14  ;;  %p609_p10 = scmp.lt.u32.totalorder %s779_s9, %s830_s4 }
 0x1de   : > { %p610_p11 = scmp.lt.u32.totalorder %s608_s24, %s604_s14  ;;  %p612_p13 = scmp.lt.u32.totalorder %s604_s14, %s779_s9 }
 0x1df   : > { %p606_p7 = pnand %p605_p6, %p738_p4 }
 0x1e0   : > { %p611_p12 = por %p610_p11, %p609_p10 }
 0x1e1   : > { %p607_p9 = pneg %p606_p7 }
 0x1e2   : > { %p613_p0 = por %p612_p13, %p611_p12 }
 0x1e4   : > { %p614_p1 = pnand %p613_p0, %p607_p9 }
 0x1e6   : > { %617 = shalt.err (!%p614_p1)
}
 0x1e7   : > { %523 = dma.vmem_to_hbm [thread:$0]  (%p738_p4), %s781_s6, 128, %s779_s9, %s376_s10  }
 0x1e8 PF: > { %p529_p2 = scmp.ge.s32.totalorder %s668_s20, 2  ;;  %s403_s29 = sand.u32 1, %s648_s15  }
 0x1e9   : > { %s404_s5 = scalar_lea.sflag [#allocation3], %s403_s29 }
 0x1ea   : > { %p526_p3 = pnand %p529_p2, %p745_p8 }
 0x1ec   : > { %643 = dma.done.wait (!%p526_p3), %s404_s5, 128  }
 0x1ed   : > { %645 = vsyncadd (!%p526_p3), %s404_s5, 4294967168  ;;  %s17_s20 = sadd.s32 1, %s668_s20   ;;  %s833_s15 = smov %s652_s16 }
 0x1ee   : > { %p14_p5 = scmp.ge.s32.totalorder %s17_s20, 4   ;;  %s834_s16 = smov %s656_s17 }
 0x1ef   : > { %s835_s17 = smov %s751_s28  ;;  %s836_s18 = smov %s664_s19 }
 0x1f0   : > { %s837_s19 = smov %s839_s23  ;;  %16 = sbr.rel (!%p14_p5) target bundleno = 4 (0x4), region = 80 }
 0x1f7   :  { %409 = vsyncpa [#allocation3], 1 }
 0x1f8   :  { %411 = vsyncpa [#allocation3 + $0x1], 1 }

</bundles_post_ra>
